<compile_context>
chip_gen: v7x
topology: tpu7x:2x2x1
jax: 0.10.0
libtpu: 0.0.40
codegen_flags: <defaults>
</compile_context>

<pallas_src>
import functools

import jax
import jax.numpy as jnp
from jax.experimental import pallas as pl
from jax.experimental.pallas import tpu as pltpu

INPUT_SIZE = 3
HIDDEN_SIZE = 4
NUM_CLASSES = 2
LANE = 128  # vreg lane width: hidden/class dims of the (tiny) weights are padded to this


def _round_up(n, m):
    return ((n + m - 1) // m) * m


def mlp_kernel(x_ref, w1_ref, b1_ref, w2_ref, b2_ref, o_ref):
    """One batch tile: y = tanh(x @ W1 + b1) @ W2 + b2."""
    x = x_ref[...]                                    # (tile_b, INPUT_SIZE)

    # ---- Layer 1 on the VPU: K = 3 is too small for the MXU; 3 broadcast FMAs. ----
    h = b1_ref[...]                                   # (1, LANE), broadcasts over rows
    for i in range(INPUT_SIZE):                       # unrolled at trace time
        h = h + x[:, i:i + 1] * w1_ref[i:i + 1, :]    # (tile_b,1)*(1,LANE) -> (tile_b,LANE)
    t = jnp.tanh(h)                                   # padded lanes stay exactly 0 (tanh(0)=0)

    # ---- Layer 2 on the MXU: canonical (tile_b,128) @ (128,128) f32 matmul. ----
    y = jnp.dot(t, w2_ref[...], preferred_element_type=jnp.float32) + b2_ref[...]

    # Store only the real class columns: 8 B/row of HBM writeback instead of 512 B/row.
    o_ref[...] = y[:, :NUM_CLASSES].astype(o_ref.dtype)


def pad_params(w1, b1, w2, b2):
    """Zero-pad weights/biases to lane-width 128 once, outside the hot path.

    Zero padding keeps the math identical: padded hidden columns get weight 0 and
    bias 0 -> tanh(0) = 0 -> they hit zero rows of w2 and contribute nothing.
    """
    w1p = jnp.zeros((INPUT_SIZE, LANE), jnp.float32).at[:, :HIDDEN_SIZE].set(w1)
    b1p = jnp.zeros((1, LANE), jnp.float32).at[:, :HIDDEN_SIZE].set(b1.reshape(1, -1))
    w2p = jnp.zeros((LANE, LANE), jnp.float32).at[:HIDDEN_SIZE, :NUM_CLASSES].set(w2)
    b2p = jnp.zeros((1, LANE), jnp.float32).at[:, :NUM_CLASSES].set(b2.reshape(1, -1))
    return w1p, b1p, w2p, b2p


@functools.partial(jax.jit, static_argnames=("tile_b",))
def n_net_forward(x, w1p, b1p, w2p, b2p, *, tile_b=512):
    """Forward pass tanh(x @ W1 + b1) @ W2 + b2, gridded over the batch dimension."""
    B = x.shape[0]
    tile_b = _round_up(min(tile_b, B), 8)        # sublane-aligned; don't over-tile tiny batches
    b_pad = _round_up(B, tile_b)
    if b_pad != B:                               # pad remainder rows only; zero rows are discarded
        x = jnp.pad(x, ((0, b_pad - B), (0, 0)))

    out = pl.pallas_call(
        mlp_kernel,
        out_shape=jax.ShapeDtypeStruct((b_pad, NUM_CLASSES), jnp.float32),
        grid_spec=pltpu.PrefetchScalarGridSpec(
            num_scalar_prefetch=0,
            grid=(b_pad // tile_b,),
            in_specs=[
                pl.BlockSpec((tile_b, INPUT_SIZE), lambda i: (i, 0)),   # x streams over batch
                pl.BlockSpec((INPUT_SIZE, LANE), lambda i: (0, 0)),     # w1 resident across grid
                pl.BlockSpec((1, LANE), lambda i: (0, 0)),              # b1 resident
                pl.BlockSpec((LANE, LANE), lambda i: (0, 0)),           # w2 resident
                pl.BlockSpec((1, LANE), lambda i: (0, 0)),              # b2 resident
            ],
            out_specs=pl.BlockSpec((tile_b, NUM_CLASSES), lambda i: (i, 0)),
        ),
        compiler_params=pltpu.CompilerParams(
            dimension_semantics=("parallel",),   # batch tiles split across TCs (v7x megacore)
        ),
    )(x, w1p, b1p, w2p, b2p)

    return out[:B]


def init_params(key):
    # Deterministic init mimicking nn.Linear's U(-1/sqrt(fan_in), 1/sqrt(fan_in)).
    k1, k2, k3, k4 = jax.random.split(key, 4)
    bound1 = 1.0 / jnp.sqrt(INPUT_SIZE)
    bound2 = 1.0 / jnp.sqrt(HIDDEN_SIZE)
    w1 = jax.random.uniform(k1, (INPUT_SIZE, HIDDEN_SIZE), jnp.float32, -bound1, bound1)
    b1 = jax.random.uniform(k2, (HIDDEN_SIZE,), jnp.float32, -bound1, bound1)
    w2 = jax.random.uniform(k3, (HIDDEN_SIZE, NUM_CLASSES), jnp.float32, -bound2, bound2)
    b2 = jax.random.uniform(k4, (NUM_CLASSES,), jnp.float32, -bound2, bound2)
    return w1, b1, w2, b2


if __name__ == "__main__":
    key = jax.random.PRNGKey(0)
    kx, kp = jax.random.split(key)

    # Small but non-trivial batch so the batch grid and remainder padding are exercised.
    B = 200
    x = jax.random.normal(kx, (B, INPUT_SIZE), jnp.float32)
    w1, b1, w2, b2 = init_params(kp)
    w1p, b1p, w2p, b2p = pad_params(w1, b1, w2, b2)   # one-time padding, outside the hot path

    out = n_net_forward(x, w1p, b1p, w2p, b2p, tile_b=64)   # grid = (4,), batch padded 200 -> 256
    jax.block_until_ready(out)

    # Pure-JAX reference on the ORIGINAL (unpadded) parameters.
    ref = jnp.tanh(x @ w1 + b1) @ w2 + b2
    assert out.shape == (B, NUM_CLASSES)
    assert jnp.allclose(out, ref, atol=1e-5), "mismatch vs reference"
    print("KERNEL_OK")
</pallas_src>

<mosaic_0001>
module attributes {stable_mosaic.version = 11 : i64} {
  func.func @mlp_kernel(%arg0: i32, %arg1: memref<64x3xf32, #tpu.memory_space<vmem>>, %arg2: memref<3x128xf32, #tpu.memory_space<vmem>>, %arg3: memref<1x128xf32, #tpu.memory_space<vmem>>, %arg4: memref<128x128xf32, #tpu.memory_space<vmem>>, %arg5: memref<1x128xf32, #tpu.memory_space<vmem>>, %arg6: memref<64x2xf32, #tpu.memory_space<vmem>>) attributes {dimension_semantics = [#tpu.dimension_semantics<parallel>], iteration_bounds = array<i64: 4>, scalar_prefetch = 0 : i64, scratch_operands = 0 : i64, tpu.core_type = #tpu.core_type<tc>, window_params = [{transform_indices = @transform_0, window_bounds = array<i64: 64, 3>}, {pipeline_mode = #tpu.pipeline_mode<synchronous>, transform_indices = @transform_1, window_bounds = array<i64: 3, 128>}, {pipeline_mode = #tpu.pipeline_mode<synchronous>, transform_indices = @transform_2, window_bounds = array<i64: 1, 128>}, {pipeline_mode = #tpu.pipeline_mode<synchronous>, transform_indices = @transform_3, window_bounds = array<i64: 128, 128>}, {pipeline_mode = #tpu.pipeline_mode<synchronous>, transform_indices = @transform_4, window_bounds = array<i64: 1, 128>}, {transform_indices = @transform_5, window_bounds = array<i64: 64, 2>}]} {
    %c0 = arith.constant 0 : index
    %c0_0 = arith.constant 0 : index
    %0 = vector.load %arg1[%c0, %c0_0] : memref<64x3xf32, #tpu.memory_space<vmem>>, vector<64x3xf32>
    %c0_1 = arith.constant 0 : index
    %c0_2 = arith.constant 0 : index
    %1 = vector.load %arg3[%c0_1, %c0_2] : memref<1x128xf32, #tpu.memory_space<vmem>>, vector<1x128xf32>
    %2 = vector.extract_strided_slice %0 {offsets = [0, 0], sizes = [64, 1], strides = [1, 1]} : vector<64x3xf32> to vector<64x1xf32>
    %c0_3 = arith.constant 0 : index
    %c0_4 = arith.constant 0 : index
    %3 = vector.load %arg2[%c0_3, %c0_4] : memref<3x128xf32, #tpu.memory_space<vmem>>, vector<1x128xf32>
    %4 = vector.broadcast %2 : vector<64x1xf32> to vector<64x128xf32>
    %5 = vector.broadcast %3 : vector<1x128xf32> to vector<64x128xf32>
    %6 = arith.mulf %4, %5 : vector<64x128xf32>
    %7 = vector.broadcast %1 : vector<1x128xf32> to vector<64x128xf32>
    %8 = arith.addf %7, %6 : vector<64x128xf32>
    %9 = vector.extract_strided_slice %0 {offsets = [0, 1], sizes = [64, 1], strides = [1, 1]} : vector<64x3xf32> to vector<64x1xf32>
    %c1 = arith.constant 1 : index
    %c0_5 = arith.constant 0 : index
    %10 = vector.load %arg2[%c1, %c0_5] : memref<3x128xf32, #tpu.memory_space<vmem>>, vector<1x128xf32>
    %11 = vector.broadcast %9 : vector<64x1xf32> to vector<64x128xf32>
    %12 = vector.broadcast %10 : vector<1x128xf32> to vector<64x128xf32>
    %13 = arith.mulf %11, %12 : vector<64x128xf32>
    %14 = arith.addf %8, %13 : vector<64x128xf32>
    %15 = vector.extract_strided_slice %0 {offsets = [0, 2], sizes = [64, 1], strides = [1, 1]} : vector<64x3xf32> to vector<64x1xf32>
    %c2 = arith.constant 2 : index
    %c0_6 = arith.constant 0 : index
    %16 = vector.load %arg2[%c2, %c0_6] : memref<3x128xf32, #tpu.memory_space<vmem>>, vector<1x128xf32>
    %17 = vector.broadcast %15 : vector<64x1xf32> to vector<64x128xf32>
    %18 = vector.broadcast %16 : vector<1x128xf32> to vector<64x128xf32>
    %19 = arith.mulf %17, %18 : vector<64x128xf32>
    %20 = arith.addf %14, %19 : vector<64x128xf32>
    %21 = math.tanh %20 : vector<64x128xf32>
    %c0_7 = arith.constant 0 : index
    %c0_8 = arith.constant 0 : index
    %22 = vector.load %arg4[%c0_7, %c0_8] : memref<128x128xf32, #tpu.memory_space<vmem>>, vector<128x128xf32>
    %cst = arith.constant dense<0.000000e+00> : vector<64x128xf32>
    %23 = tpu.matmul %21, %22, %cst {dimension_numbers = #tpu.dot_dimension_numbers<[1], [0], [0], [1], [0, 0, 1, 1], [], []>} : vector<64x128xf32>, vector<128x128xf32>, vector<64x128xf32> -> vector<64x128xf32>
    %c0_9 = arith.constant 0 : index
    %c0_10 = arith.constant 0 : index
    %24 = vector.load %arg5[%c0_9, %c0_10] : memref<1x128xf32, #tpu.memory_space<vmem>>, vector<1x128xf32>
    %25 = vector.broadcast %24 : vector<1x128xf32> to vector<64x128xf32>
    %26 = arith.addf %23, %25 : vector<64x128xf32>
    %27 = vector.extract_strided_slice %26 {offsets = [0, 0], sizes = [64, 2], strides = [1, 1]} : vector<64x128xf32> to vector<64x2xf32>
    %c0_11 = arith.constant 0 : index
    %c0_12 = arith.constant 0 : index
    %28 = vector.load %arg6[%c0_11, %c0_12] : memref<64x2xf32, #tpu.memory_space<vmem>>, vector<64x2xf32>
    tpu.vector_store %arg6[%c0_11, %c0_12], %27 {strides = array<i32>} : memref<64x2xf32, #tpu.memory_space<vmem>>, vector<64x2xf32>,
    return
  }
  func.func @transform_0(%arg0: i32) -> (i32, i32) {
    %c0_i32 = arith.constant 0 : i32
    %c0_i32_0 = arith.constant 0 : i32
    return %arg0, %c0_i32 : i32, i32
  }
  func.func @transform_1(%arg0: i32) -> (i32, i32) {
    %c0_i32 = arith.constant 0 : i32
    %c0_i32_0 = arith.constant 0 : i32
    %c0_i32_1 = arith.constant 0 : i32
    return %c0_i32, %c0_i32_0 : i32, i32
  }
  func.func @transform_2(%arg0: i32) -> (i32, i32) {
    %c0_i32 = arith.constant 0 : i32
    %c0_i32_0 = arith.constant 0 : i32
    %c0_i32_1 = arith.constant 0 : i32
    return %c0_i32, %c0_i32_0 : i32, i32
  }
  func.func @transform_3(%arg0: i32) -> (i32, i32) {
    %c0_i32 = arith.constant 0 : i32
    %c0_i32_0 = arith.constant 0 : i32
    %c0_i32_1 = arith.constant 0 : i32
    return %c0_i32, %c0_i32_0 : i32, i32
  }
  func.func @transform_4(%arg0: i32) -> (i32, i32) {
    %c0_i32 = arith.constant 0 : i32
    %c0_i32_0 = arith.constant 0 : i32
    %c0_i32_1 = arith.constant 0 : i32
    return %c0_i32, %c0_i32_0 : i32, i32
  }
  func.func @transform_5(%arg0: i32) -> (i32, i32) {
    %c0_i32 = arith.constant 0 : i32
    %c0_i32_0 = arith.constant 0 : i32
    return %arg0, %c0_i32 : i32, i32
  }
}

</mosaic_0001>

<bundles_post_ra>
// kernel: n_net_forward.1
= control target key start
LH: loop header
LB: loop body
LE: loop exit
PB: predicated region body
PF: predicated region fallthrough
CT: control target
= control target key end

     0   :  { %s822_s18 = smov 0   ;;  %s997_s0 = inlined_call_operand.vmem [shape: f32[256,3], index: 0, kind: input, shape index: {}]   ;;  %s998_s1 = inlined_call_operand.vmem [shape: f32[3,128], index: 1, kind: input, shape index: {}]   ;;  %s999_s2 = inlined_call_operand.vmem [shape: f32[1,128], index: 2, kind: input, shape index: {}]   ;;  %s1000_s3 = inlined_call_operand.vmem [shape: f32[128,128], index: 3, kind: input, shape index: {}]   ;;  %s1001_s4 = inlined_call_operand.vmem [shape: f32[1,128], index: 4, kind: input, shape index: {}]   ;;  %s1002_s5 = inlined_call_operand.vmem [shape: f32[256,2], index: 5, kind: output, shape index: {}]  }
   0x1 LB: > { %s611_s19 = sadd.s32 4294967295, %s787_s18   ;;  %p615_p0 = scmp.ge.s32.totalorder %s787_s18, 1  ;;  %s787_s18 = sphi %s822_s18, %s15_s18  }
   0x2   : > { %p188_p1 = scmp.lt.s32.totalorder %s787_s18, 5 }
   0x4   : > { %p189_p2 = pnand %p615_p0, %p188_p1 }
   0x5   : > { %s616_s20 = sshll.u32 (!%p189_p2), %s611_s19, 3  ;;  %v789_v0 = vmov (!%p189_p2), 0   ;;  %v790_v6 = vmov (!%p189_p2), 1   ;;  %v418_v8 = vld [vmem:[%s1000_s3] sm:$0xff] (!%p189_p2)  ;;  %v419_v9 = vld [vmem:[%s1000_s3 + $0x8] sm:$0xff] (!%p189_p2)  ;;  %v420_v11 = vld [vmem:[%s1000_s3 + $0x10] sm:$0xff] (!%p189_p2) }
   0x6   : > { %192 = sbr.rel (%p189_p2) target bundleno = 435 (0x1b3), region = 40  ;;  %755 = vset.pattern.permute.xlu1 (!%p189_p2), %v789_v0  ;;  %754 = vset.pattern.permute.xlu0 (!%p189_p2), %v789_v0  ;;  %p217_p3 = scmp.lt.s32.totalorder (!%p189_p2), %s616_s20, 31  ;;  %v695_v10 = vpack.c.bf16 (!%p189_p2), %v419_v9, %v418_v8  ;;  %v421_v12 = vld [vmem:[%s1000_s3 + $0x18] sm:$0xff] (!%p189_p2)  ;;  %v422_v15 = vld [vmem:[%s1000_s3 + $0x20] sm:$0xff] (!%p189_p2)  ;;  %v423_v16 = vld [vmem:[%s1000_s3 + $0x28] sm:$0xff] (!%p189_p2)  ;;  %v791_v18 = vmov (!%p189_p2), 2  }
   0x7   : > { %v699_v14 = vpack.c.bf16 (!%p189_p2), %v421_v12, %v420_v11  ;;  %v703_v17 = vpack.c.bf16 (!%p189_p2), %v423_v16, %v422_v15  ;;  %v424_v19 = vld [vmem:[%s1000_s3 + $0x30] sm:$0xff] (!%p189_p2)  ;;  %v425_v20 = vld [vmem:[%s1000_s3 + $0x38] sm:$0xff] (!%p189_p2)  ;;  %v426_v22 = vld [vmem:[%s1000_s3 + $0x40] sm:$0xff] (!%p189_p2)  ;;  %vm546_vm0 = vcmask (!%p189_p2), 15360  }
   0x8   : > { %696 = vmatprep.subr.bf16.mxu0 (!%p189_p2), %v695_v10  ;;  %727 = vmatprep.subr.bf16.mxu1 (!%p189_p2), %v695_v10  ;;  %v707_v21 = vpack.c.bf16 (!%p189_p2), %v425_v20, %v424_v19  ;;  %v427_v23 = vld [vmem:[%s1000_s3 + $0x48] sm:$0xff] (!%p189_p2)  ;;  %v428_v26 = vld [vmem:[%s1000_s3 + $0x50] sm:$0xff] (!%p189_p2)  ;;  %v429_v27 = vld [vmem:[%s1000_s3 + $0x58] sm:$0xff] (!%p189_p2) }
   0x9   : > { %698 = vmatpush3.bf16.msra.mxu0 (!%p189_p2), %v695_v10  ;;  %735 = vmatpush3.bf16.msra.mxu1 (!%p189_p2), %v695_v10  ;;  %v711_v24 = vpack.c.bf16 (!%p189_p2), %v427_v23, %v426_v22  ;;  %v715_v28 = vpack.c.bf16 (!%p189_p2), %v429_v27, %v428_v26  ;;  %v430_v29 = vld [vmem:[%s1000_s3 + $0x60] sm:$0xff] (!%p189_p2)  ;;  %v431_v30 = vld [vmem:[%s1000_s3 + $0x68] sm:$0xff] (!%p189_p2)  ;;  %v432_v32 = vld [vmem:[%s1000_s3 + $0x70] sm:$0xff] (!%p189_p2) }
   0xa   : > { %700 = vmatprep.subr.bf16.mxu0 (!%p189_p2), %v699_v14  ;;  %728 = vmatprep.subr.bf16.mxu1 (!%p189_p2), %v699_v14  ;;  %v719_v31 = vpack.c.bf16 (!%p189_p2), %v431_v30, %v430_v29  ;;  %v433_v33 = vld [vmem:[%s1000_s3 + $0x78] sm:$0xff] (!%p189_p2)  ;;  %v928_v42 = vld [vmem:[%s998_s1] ss:$0 sm:$0xff] (!%p189_p2)  ;;  %v939_v46 = vld [vmem:[%s998_s1 + $0x1] ss:$0 sm:$0xff] (!%p189_p2) }
   0xb   : > { %v723_v34 = vpack.c.bf16 (!%p189_p2), %v433_v33, %v432_v32  ;;  %v934_v45 = vld [vmem:[%s999_s2] ss:$0 sm:$0xff] (!%p189_p2)  ;;  %v947_v53 = vld [vmem:[%s998_s1 + $0x2] ss:$0 sm:$0xff] (!%p189_p2) }
   0xd   : > { %s1004_s20 = smov (!%p217_p3, %s616_s20), 31  ;;  %702 = vmatpush3.bf16.msra.mxu0 %v699_v14  ;;  %736 = vmatpush3.bf16.msra.mxu1 %v699_v14 }
   0xe   : > { %s617_s21 = sshll.u32 %s1004_s20, 3  ;;  %704 = vmatprep.subr.bf16.mxu0 %v703_v17  ;;  %729 = vmatprep.subr.bf16.mxu1 %v703_v17 }
   0xf   : > { %s840_s24 = scalar_lea.vmem %s997_s0, %s617_s21  ;;  %s226_s26 = scalar_lea.vmem %s1002_s5, %s617_s21 }
  0x10   : > { %v229_v1 = vld [vmem:[%s840_s24 + $0x8] sm:$0xff]  ;;  %v228_v2 = vld [vmem:[%s840_s24] sm:$0xff]  ;;  %v850_v5 = vld [vmem:[%s840_s24 + $0x30] sm:$0xff] }
  0x11   : > { %245 = vperm.xlu1 %755, %v229_v1   ;;  %240 = vperm.xlu0 %754, %v228_v2   ;;  %v845_v3 = vld [vmem:[%s840_s24 + $0x28] sm:$0xff]  ;;  %v232_v4 = vld [vmem:[%s840_s24 + $0x20] sm:$0xff]  ;;  %v855_v7 = vld [vmem:[%s840_s24 + $0x18] sm:$0xff] }
  0x12   : > { %v871_v13 = vld [vmem:[%s840_s24 + $0x10] sm:$0xff]  ;;  %706 = vmatpush3.bf16.msra.mxu0 %v703_v17  ;;  %737 = vmatpush3.bf16.msra.mxu1 %v703_v17  ;;  %v235_v25 = vld [vmem:[%s840_s24 + $0x38] sm:$0xff] }
  0x13   : > { %708 = vmatprep.subr.bf16.mxu0 %v707_v21  ;;  %730 = vmatprep.subr.bf16.mxu1 %v707_v21 }
  0x15   : > { %265 = vperm.xlu1 %755, %v845_v3   ;;  %260 = vperm.xlu0 %754, %v232_v4  }
  0x16   : > { %710 = vmatpush3.bf16.msra.mxu0 %v707_v21  ;;  %738 = vmatpush3.bf16.msra.mxu1 %v707_v21 }
  0x17   : > { %712 = vmatprep.subr.bf16.mxu0 %v711_v24  ;;  %731 = vmatprep.subr.bf16.mxu1 %v711_v24 }
  0x19   : > { %756 = vset.pattern.permute.xlu1 %v790_v6  ;;  %270 = vperm.xlu0 %754, %v850_v5  }
  0x1a   : > { %322 = vperm.xlu1 %756, %v232_v4   ;;  %714 = vmatpush3.bf16.msra.mxu0 %v711_v24 }
  0x1b   : > { %739 = vmatpush3.bf16.msra.mxu1 %v711_v24  ;;  %716 = vmatprep.subr.bf16.mxu0 %v715_v28 }
  0x1c   : > { %732 = vmatprep.subr.bf16.mxu1 %v715_v28 }
  0x1d   : > { %255 = vperm.xlu0 %754, %v855_v7  }
  0x1e   : > { %310 = vperm.xlu1 %756, %v229_v1   ;;  %718 = vmatpush3.bf16.msra.mxu0 %v715_v28 }
  0x1f   : > { %740 = vmatpush3.bf16.msra.mxu1 %v715_v28  ;;  %720 = vmatprep.subr.bf16.mxu0 %v719_v31 }
  0x20   : > { %733 = vmatprep.subr.bf16.mxu1 %v719_v31 }
  0x21   : > { %759 = vset.pattern.permute.xlu0 %v790_v6 }
  0x22   : > { %757 = vset.pattern.permute.xlu1 %v789_v0  ;;  %306 = vperm.xlu0 %759, %v228_v2  }
  0x23   : > { %250 = vperm.xlu1 %757, %v871_v13   ;;  %722 = vmatpush3.bf16.msra.mxu0 %v719_v31 }
  0x24   : > { %741 = vmatpush3.bf16.msra.mxu1 %v719_v31  ;;  %724 = vmatprep.subr.bf16.mxu0 %v723_v34 }
  0x25   : > { %734 = vmatprep.subr.bf16.mxu1 %v723_v34 }
  0x26   : > { %326 = vperm.xlu0 %759, %v845_v3  }
  0x27   : > { %758 = vset.pattern.permute.xlu1 %v791_v18  ;;  %726 = vmatpush3.bf16.msra.mxu0 %v723_v34 }
  0x28   : > { %359 = vperm.xlu1 %758, %v228_v2   ;;  %742 = vmatpush3.bf16.msra.mxu1 %v723_v34 }
  0x2a   : > { %330 = vperm.xlu0 %759, %v850_v5  }
  0x2c   : > { %375 = vperm.xlu1 %758, %v232_v4  }
  0x2e   : > { %763 = vset.pattern.permute.xlu0 %v791_v18 }
  0x2f   : > { %363 = vperm.xlu0 %763, %v229_v1  }
  0x30   : > { %760 = vset.pattern.permute.xlu1 %v789_v0 }
  0x31   : > { %275 = vperm.xlu1 %760, %v235_v25  }
  0x33   : > { %367 = vperm.xlu0 %763, %v871_v13  }
  0x35   : > { %761 = vset.pattern.permute.xlu1 %v791_v18 }
  0x36   : > { %379 = vperm.xlu1 %761, %v845_v3  }
  0x37   : > { %387 = vperm.xlu0 %763, %v235_v25  }
  0x3a   : > { %762 = vset.pattern.permute.xlu1 %v790_v6 }
  0x3b   : > { %314 = vperm.xlu1 %762, %v871_v13  }
  0x3f   : > { %318 = vperm.xlu1 %762, %v855_v7  }
  0x43   : > { %334 = vperm.xlu1 %762, %v235_v25  }
  0x47   : > { %764 = vset.pattern.permute.xlu1 %v791_v18 }
  0x48   : > { %383 = vperm.xlu1 %764, %v850_v5  }
  0x4c   : > { %371 = vperm.xlu1 %764, %v855_v7  }
  0x90   : > { %v246_v35 = vpop.permute.xlu1 %245  ;;  %v241_v36 = vpop.permute.xlu0 %240 }
  0x91   : > { %v282_v44 = vmul.f32 %v928_v42, %v241_v36  ;;  %v283_v59 = vmul.f32 %v928_v42, %v246_v35 }
  0x93   : > { %v296_v48 = vadd.f32 %v934_v45, %v282_v44  ;;  %v297_v2 = vadd.f32 %v934_v45, %v283_v59 }
  0x94   : > { %v266_v37 = vpop.permute.xlu1 %265  ;;  %v261_v38 = vpop.permute.xlu0 %260 }
  0x95   : > { %v286_v51 = vmul.f32 %v928_v42, %v261_v38  ;;  %v287_v7 = vmul.f32 %v928_v42, %v266_v37 }
  0x97   : > { %v300_v56 = vadd.f32 %v934_v45, %v286_v51  ;;  %v301_v11 = vadd.f32 %v934_v45, %v287_v7 }
  0x98   : > { %v271_v39 = vpop.permute.xlu0 %270 }
  0x99   : > { %v323_v40 = vpop.permute.xlu1 %322  ;;  %v288_v29 = vmul.f32 %v928_v42, %v271_v39 }
  0x9a   : > { %v345_v57 = vmul.f32 %v939_v46, %v323_v40 }
  0x9b   : > { %v302_v38 = vadd.f32 %v934_v45, %v288_v29 }
  0x9c   : > { %v923_v41 = vpop.permute.xlu0 %255  ;;  %v353_v0 = vadd.f32 %v345_v57, %v300_v56 }
  0x9d   : > { %v311_v43 = vpop.permute.xlu1 %310  ;;  %v285_v40 = vmul.f32 %v928_v42, %v923_v41 }
  0x9e   : > { %v342_v62 = vmul.f32 %v939_v46, %v311_v43 }
  0xa0   : > { %v350_v5 = vadd.f32 %v342_v62, %v297_v2 }
  0xa1   : > { %v307_v47 = vpop.permute.xlu0 %306 }
  0xa2   : > { %v341_v49 = vmul.f32 %v939_v46, %v307_v47  ;;  %v251_v50 = vpop.permute.xlu1 %250 }
  0xa3   : > { %v284_v16 = vmul.f32 %v928_v42, %v251_v50 }
  0xa4   : > { %v349_v54 = vadd.f32 %v341_v49, %v296_v48  ;;  %v299_v49 = vadd.f32 %v934_v45, %v285_v40 }
  0xa5   : > { %v327_v52 = vpop.permute.xlu0 %326  ;;  %v298_v21 = vadd.f32 %v934_v45, %v284_v16 }
  0xa6   : > { %v346_v10 = vmul.f32 %v939_v46, %v327_v52 }
  0xa7   : > { %v360_v55 = vpop.permute.xlu1 %359 }
  0xa8   : > { %v394_v58 = vmul.f32 %v947_v53, %v360_v55  ;;  %v354_v14 = vadd.f32 %v346_v10, %v301_v11 }
  0xa9   : > { %v331_v60 = vpop.permute.xlu0 %330 }
  0xaa   : > { %v402_v61 = vadd.f32 %v394_v58, %v349_v54  ;;  %v347_v35 = vmul.f32 %v939_v46, %v331_v60 }
  0xab   : > { %v376_v63 = vpop.permute.xlu1 %375 }
  0xac   : > { %v398_v1 = vmul.f32 %v947_v53, %v376_v63  ;;  %765 = vtanh.f32 %v402_v61  ;;  %v355_v39 = vadd.f32 %v347_v35, %v302_v38 }
  0xae   : > { %v406_v3 = vadd.f32 %v398_v1, %v353_v0  ;;  %v364_v4 = vpop.permute.xlu0 %363 }
  0xaf   : > { %v395_v6 = vmul.f32 %v947_v53, %v364_v4 }
  0xb0   : > { %v276_v8 = vpop.permute.xlu1 %275  ;;  %767 = vtanh.f32 %v406_v3 }
  0xb1   : > { %v403_v9 = vadd.f32 %v395_v6, %v350_v5  ;;  %v289_v27 = vmul.f32 %v928_v42, %v276_v8 }
  0xb2   : > { %v368_v18 = vpop.permute.xlu0 %367 }
  0xb3   : > { %769 = vtanh.f32 %v403_v9  ;;  %v396_v23 = vmul.f32 %v947_v53, %v368_v18  ;;  %v303_v32 = vadd.f32 %v934_v45, %v289_v27  ;;  %v624_v45 = vld [vmem:[%s1001_s4] ss:$0 sm:$0xff] }
  0xb5   : > { %v380_v12 = vpop.permute.xlu1 %379 }
  0xb6   : > { %v766_v13 = vpop.eup %765  ;;  %v399_v15 = vmul.f32 %v947_v53, %v380_v12  ;;  %v388_v31 = vpop.permute.xlu0 %387 }
  0xb7   : > { %683 = vmatprep.mubr.f32.mxu0 %v766_v13  ;;  %v401_v37 = vmul.f32 %v947_v53, %v388_v31 }
  0xb8   : > { %v407_v17 = vadd.f32 %v399_v15, %v354_v14 }
  0xba   : > { %v768_v19 = vpop.eup %767  ;;  %771 = vtanh.f32 %v407_v17  ;;  %v315_v20 = vpop.permute.xlu1 %314 }
  0xbb   : > { %v343_v22 = vmul.f32 %v939_v46, %v315_v20  ;;  %689 = vmatprep.mubr.f32.mxu1 %v768_v19 }
  0xbd   : > { %v770_v24 = vpop.eup %769  ;;  %v351_v25 = vadd.f32 %v343_v22, %v298_v21 }
  0xbe   : > { %v319_v26 = vpop.permute.xlu1 %318  ;;  %684 = vmatmul.mubr.f32.vlgmr.msra.gmra.mrb[0].mxu0 %v770_v24 }
  0xbf   : > { %v404_v28 = vadd.f32 %v396_v23, %v351_v25  ;;  %v344_v44 = vmul.f32 %v939_v46, %v319_v26 }
  0xc1   : > { %773 = vtanh.f32 %v404_v28  ;;  %v352_v54 = vadd.f32 %v344_v44, %v299_v49 }
  0xc2   : > { %v335_v30 = vpop.permute.xlu1 %334 }
  0xc3   : > { %v348_v33 = vmul.f32 %v939_v46, %v335_v30 }
  0xc4   : > { %v772_v34 = vpop.eup %771 }
  0xc5   : > { %v356_v36 = vadd.f32 %v348_v33, %v303_v32  ;;  %690 = vmatmul.mubr.f32.vlgmr.msra.gmra.mrb[0].mxu1 %v772_v34 }
  0xc7   : > { %v384_v43 = vpop.permute.xlu1 %383  ;;  %v409_v48 = vadd.f32 %v401_v37, %v356_v36 }
  0xc8   : > { %v400_v47 = vmul.f32 %v947_v53, %v384_v43 }
  0xca   : > { %v408_v50 = vadd.f32 %v400_v47, %v355_v39 }
  0xcb   : > { %v774_v51 = vpop.eup %773  ;;  %v372_v52 = vpop.permute.xlu1 %371 }
  0xcc   : > { %775 = vtanh.f32 %v408_v50  ;;  %v397_v55 = vmul.f32 %v947_v53, %v372_v52  ;;  %686 = vmatprep.mubr.f32.mxu0 %v774_v51 }
  0xcd   : > { %777 = vtanh.f32 %v409_v48 }
  0xce   : > { %v405_v41 = vadd.f32 %v397_v55, %v352_v54 }
  0xd0   : > { %779 = vtanh.f32 %v405_v41 }
  0xd6   : > { %v776_v42 = vpop.eup %775 }
  0xd7   : > { %v778_v56 = vpop.eup %777  ;;  %692 = vmatprep.mubr.f32.mxu1 %v776_v42 }
  0xd8   : > { %693 = vmatmul.mubr.f32.gmra.mrb[2].mxu1 %v778_v56 }
  0xda   : > { %v780_v46 = vpop.eup %779 }
  0xdb   : > { %687 = vmatmul.mubr.f32.gmra.mrb[2].mxu0 %v780_v46 }
 0x191   : > { %v685_v53 = vpop.f32.mrb[0].mxu0 }
 0x192   : > { %v513_v57 = vadd.f32 %v685_v53, %v624_v45  ;;  %v507_v58 = vpop.f32.mrb[1].mxu0 }
 0x193   : > { %v508_v59 = vadd.f32 %v624_v45, %v507_v58 }
 0x194   : > { %548 = vst.msk [vmem:[%s226_s26 + $0x8] sm:$0xff] %vm546_vm0, %v513_v57 }
 0x195   : > { %547 = vst.msk [vmem:[%s226_s26] sm:$0xff] %vm546_vm0, %v508_v59 }
 0x198   : > { %v691_v60 = vpop.f32.mrb[0].mxu1 }
 0x199   : > { %v533_v61 = vadd.f32 %v691_v60, %v624_v45  ;;  %v527_v62 = vpop.f32.mrb[1].mxu1 }
 0x19a   : > { %v528_v63 = vadd.f32 %v624_v45, %v527_v62 }
 0x19b   : > { %552 = vst.msk [vmem:[%s226_s26 + $0x28] sm:$0xff] %vm546_vm0, %v533_v61 }
 0x19c   : > { %551 = vst.msk [vmem:[%s226_s26 + $0x20] sm:$0xff] %vm546_vm0, %v528_v63 }
 0x1ab   : > { %v694_v0 = vpop.f32.mrb[2].mxu1 }
 0x1ac   : > { %v543_v1 = vadd.f32 %v694_v0, %v624_v45  ;;  %v537_v2 = vpop.f32.mrb[3].mxu1 }
 0x1ad   : > { %v538_v3 = vadd.f32 %v624_v45, %v537_v2 }
 0x1ae   : > { %554 = vst.msk [vmem:[%s226_s26 + $0x38] sm:$0xff] %vm546_vm0, %v543_v1  ;;  %v688_v4 = vpop.f32.mrb[2].mxu0 }
 0x1af   : > { %553 = vst.msk [vmem:[%s226_s26 + $0x30] sm:$0xff] %vm546_vm0, %v538_v3  ;;  %v523_v5 = vadd.f32 %v688_v4, %v624_v45  ;;  %v517_v6 = vpop.f32.mrb[3].mxu0 }
 0x1b0   : > { %v518_v7 = vadd.f32 %v624_v45, %v517_v6 }
 0x1b1   : > { %550 = vst.msk [vmem:[%s226_s26 + $0x18] sm:$0xff] %vm546_vm0, %v523_v5 }
 0x1b2   : > { %549 = vst.msk [vmem:[%s226_s26 + $0x10] sm:$0xff] %vm546_vm0, %v518_v7 }
 0x1b3 PF: > { %s15_s18 = sadd.s32 1, %s787_s18  }
 0x1b4   : > { %p12_p4 = scmp.ge.s32.totalorder %s15_s18, 6  }
 0x1b6   :  { %14 = sbr.rel (!%p12_p4) target bundleno = 1 (0x1), region = 70 }

</bundles_post_ra>
